<compile_context>
chip_gen: v5e
topology: v5e:2x2
jax: 0.10.0
libtpu: 0.0.40
codegen_flags: <defaults>
</compile_context>

<pallas_src>
import jax
import jax.numpy as jnp
from jax.experimental import pallas as pl
from jax.experimental.pallas import tpu as pltpu

INPUT_DIM = 32
HIDDEN_DIMS = [512, 256, 128, 64]
BN_EPS = 1e-5
MAX_TILE_B = 1024   # multiple of 8; fits v5e's 16 MiB scoped-VMEM default without flags


def _round_up(x, m):
    return ((x + m - 1) // m) * m


def _xavier_uniform(key, fan_in, fan_out):
    bound = jnp.sqrt(6.0 / (fan_in + fan_out))
    return jax.random.uniform(key, (fan_in, fan_out), jnp.float32, -bound, bound)


def init_params(key, input_dim=INPUT_DIM, hidden_dims=HIDDEN_DIMS):
    """Flat list [w0, b0, ..., w4, b4].

    Hidden weights are (in, out) (PyTorch weight.T) in bf16 with eval-mode BatchNorm
    folded in; hidden biases are (1, out) f32.  The final Linear(64, 1) is kept as an
    f32 row vector w4:(1, 64) and scalar b4:(1, 1) so the kernel evaluates it on the
    VPU (broadcast multiply + lane reduction) instead of a padded MXU pass.
    """
    dims = [input_dim] + list(hidden_dims)
    params = []
    for fan_in, fan_out in zip(dims[:-1], dims[1:]):
        key, sub = jax.random.split(key)
        w = _xavier_uniform(sub, fan_in, fan_out)            # nn.init.xavier_uniform_
        b = jnp.zeros((fan_out,), jnp.float32)                # nn.init.zeros_
        # Fold BatchNorm1d(fan_out) eval-mode affine (init-time running stats).
        gamma = jnp.ones((fan_out,), jnp.float32)
        beta = jnp.zeros((fan_out,), jnp.float32)
        running_mean = jnp.zeros((fan_out,), jnp.float32)
        running_var = jnp.ones((fan_out,), jnp.float32)
        scale = gamma / jnp.sqrt(running_var + BN_EPS)
        w = w * scale[None, :]
        b = (b - running_mean) * scale + beta
        params.append(w.astype(jnp.bfloat16))
        params.append(b.reshape(1, -1).astype(jnp.float32))
    # Final head Linear(64, 1): keep f32, stored as a (1, 64) row for VPU broadcast.
    key, sub = jax.random.split(key)
    w4 = _xavier_uniform(sub, dims[-1], 1)                    # (64, 1)
    params.append(w4.T.astype(jnp.float32))                   # (1, 64)
    params.append(jnp.zeros((1, 1), jnp.float32))              # b4
    return params


def _mlp_kernel(x_ref,
                w0_ref, b0_ref, w1_ref, b1_ref, w2_ref, b2_ref,
                w3_ref, b3_ref, w4_ref, b4_ref,
                o_ref):
    """Fused forward for one batch tile.

    4 x (bf16 MXU matmul -> f32 bias -> ReLU), activations recast to bf16 between MXU
    layers; the 64->1 head runs on the VPU/XLU (broadcast mul + lane reduction) so no
    MXU pass is wasted producing padded zero columns.  Dropout == identity in eval.
    """
    h = x_ref[...]                                            # (tile_b, 32) bf16
    hidden = ((w0_ref, b0_ref), (w1_ref, b1_ref),
              (w2_ref, b2_ref), (w3_ref, b3_ref))
    for i, (w_ref, b_ref) in enumerate(hidden):
        acc = jnp.dot(h, w_ref[...], preferred_element_type=jnp.float32) + b_ref[...]
        acc = jnp.maximum(acc, 0.0)                           # ReLU (f32)
        h = acc.astype(jnp.bfloat16) if i < 3 else acc        # bf16 feed to next MXU layer
    # Final Linear(64, 1): VPU multiply against the broadcast row + lane reduction.
    o_ref[...] = jnp.sum(h * w4_ref[...], axis=-1, keepdims=True) + b4_ref[...]


def deep_nn_forward(x, params, *, max_tile_b=MAX_TILE_B):
    batch, input_dim = x.shape
    x = x.astype(jnp.bfloat16)                                # halves the x DMA; layer 0 is bf16

    # Batch tile: multiple of 8, <= max_tile_b, and >= 2 grid steps whenever the batch
    # allows it so the "parallel" grid axis shards across v7x's 2 TensorCores.
    padded8 = _round_up(max(batch, 8), 8)
    if padded8 >= 16:
        tile_b = min(max_tile_b, _round_up(pl.cdiv(padded8, 2), 8))
    else:
        tile_b = padded8
    padded = _round_up(padded8, tile_b)
    if padded != batch:
        x = jnp.pad(x, ((0, padded - batch), (0, 0)))
    grid = (padded // tile_b,)

    in_specs = [pl.BlockSpec((tile_b, input_dim), lambda i: (i, 0))]
    for p in params:                                          # weights/biases stay VMEM-resident
        in_specs.append(pl.BlockSpec(p.shape, lambda i: (0, 0)))
    out_spec = pl.BlockSpec((tile_b, 1), lambda i: (i, 0))    # compact (padded, 1) writeback

    dims = [input_dim] + list(HIDDEN_DIMS) + [1]
    flops = 2 * padded * sum(a * b for a, b in zip(dims[:-1], dims[1:]))
    weight_bytes = sum(int(p.size) * p.dtype.itemsize for p in params)
    bytes_accessed = padded * input_dim * 2 + weight_bytes + padded * 4

    out = pl.pallas_call(
        _mlp_kernel,
        out_shape=jax.ShapeDtypeStruct((padded, 1), jnp.float32),
        grid=grid,
        in_specs=in_specs,
        out_specs=out_spec,
        compiler_params=pltpu.CompilerParams(
            dimension_semantics=("parallel",)),               # 2x on v7x megacore; no-op v5e/v6e
        cost_estimate=pl.CostEstimate(
            flops=flops, transcendentals=0, bytes_accessed=bytes_accessed),
    )(x, *params)
    return out[:batch]                                        # drop batch padding only


def _reference_forward(x, params):
    """Plain-JAX reference using the same bf16-MXU / f32-accumulate / VPU-head recipe."""
    h = x.astype(jnp.bfloat16)
    for i in range(4):
        acc = jnp.dot(h, params[2 * i],
                      preferred_element_type=jnp.float32) + params[2 * i + 1]
        acc = jnp.maximum(acc, 0.0)
        h = acc.astype(jnp.bfloat16) if i < 3 else acc
    return jnp.sum(h * params[8], axis=-1, keepdims=True) + params[9]


if __name__ == "__main__":
    key = jax.random.PRNGKey(0)
    pkey, xkey = jax.random.split(key)

    params = init_params(pkey)
    x = jax.random.normal(xkey, (8, INPUT_DIM), jnp.float32)   # batch=8, input_dim=32

    out = jax.block_until_ready(deep_nn_forward(x, params))

    ref = _reference_forward(x, params)
    assert out.shape == (8, 1), out.shape
    assert jnp.allclose(out, ref, atol=1e-3, rtol=1e-3), "mismatch vs reference"

    print("KERNEL_OK")
</pallas_src>

<mosaic_0001>
module attributes {stable_mosaic.version = 11 : i64} {
  func.func @_mlp_kernel(%arg0: i32, %arg1: memref<8x32xbf16, #tpu.memory_space<vmem>>, %arg2: memref<32x512xbf16, #tpu.memory_space<vmem>>, %arg3: memref<1x512xf32, #tpu.memory_space<vmem>>, %arg4: memref<512x256xbf16, #tpu.memory_space<vmem>>, %arg5: memref<1x256xf32, #tpu.memory_space<vmem>>, %arg6: memref<256x128xbf16, #tpu.memory_space<vmem>>, %arg7: memref<1x128xf32, #tpu.memory_space<vmem>>, %arg8: memref<128x64xbf16, #tpu.memory_space<vmem>>, %arg9: memref<1x64xf32, #tpu.memory_space<vmem>>, %arg10: memref<1x64xf32, #tpu.memory_space<vmem>>, %arg11: memref<1x1xf32, #tpu.memory_space<vmem>>, %arg12: memref<8x1xf32, #tpu.memory_space<vmem>>) attributes {dimension_semantics = [#tpu.dimension_semantics<parallel>], iteration_bounds = array<i64: 1>, scalar_prefetch = 0 : i64, scratch_operands = 0 : i64, tpu.core_type = #tpu.core_type<tc>, window_params = [{transform_indices = @transform_0, window_bounds = array<i64: 8, 32>}, {pipeline_mode = #tpu.pipeline_mode<synchronous>, transform_indices = @transform_1, window_bounds = array<i64: 32, 512>}, {pipeline_mode = #tpu.pipeline_mode<synchronous>, transform_indices = @transform_2, window_bounds = array<i64: 1, 512>}, {pipeline_mode = #tpu.pipeline_mode<synchronous>, transform_indices = @transform_3, window_bounds = array<i64: 512, 256>}, {pipeline_mode = #tpu.pipeline_mode<synchronous>, transform_indices = @transform_4, window_bounds = array<i64: 1, 256>}, {pipeline_mode = #tpu.pipeline_mode<synchronous>, transform_indices = @transform_5, window_bounds = array<i64: 256, 128>}, {pipeline_mode = #tpu.pipeline_mode<synchronous>, transform_indices = @transform_6, window_bounds = array<i64: 1, 128>}, {pipeline_mode = #tpu.pipeline_mode<synchronous>, transform_indices = @transform_7, window_bounds = array<i64: 128, 64>}, {pipeline_mode = #tpu.pipeline_mode<synchronous>, transform_indices = @transform_8, window_bounds = array<i64: 1, 64>}, {pipeline_mode = #tpu.pipeline_mode<synchronous>, transform_indices = @transform_9, window_bounds = array<i64: 1, 64>}, {pipeline_mode = #tpu.pipeline_mode<synchronous>, transform_indices = @transform_10, window_bounds = array<i64: 1, 1>}, {transform_indices = @transform_11, window_bounds = array<i64: 8, 1>}]} {
    %c0 = arith.constant 0 : index
    %c0_0 = arith.constant 0 : index
    %0 = vector.load %arg1[%c0, %c0_0] : memref<8x32xbf16, #tpu.memory_space<vmem>>, vector<8x32xbf16>
    %c0_1 = arith.constant 0 : index
    %c0_2 = arith.constant 0 : index
    %1 = vector.load %arg2[%c0_1, %c0_2] : memref<32x512xbf16, #tpu.memory_space<vmem>>, vector<32x512xbf16>
    %cst = arith.constant dense<0.000000e+00> : vector<8x512xf32>
    %2 = tpu.matmul %0, %1, %cst {dimension_numbers = #tpu.dot_dimension_numbers<[1], [0], [0], [1], [0, 0, 1, 1], [], []>} : vector<8x32xbf16>, vector<32x512xbf16>, vector<8x512xf32> -> vector<8x512xf32>
    %c0_3 = arith.constant 0 : index
    %c0_4 = arith.constant 0 : index
    %3 = vector.load %arg3[%c0_3, %c0_4] : memref<1x512xf32, #tpu.memory_space<vmem>>, vector<1x512xf32>
    %4 = vector.broadcast %3 : vector<1x512xf32> to vector<8x512xf32>
    %5 = arith.addf %2, %4 : vector<8x512xf32>
    %cst_5 = arith.constant 0.000000e+00 : f32
    %6 = vector.broadcast %cst_5 : f32 to vector<8x512xf32>
    %7 = arith.maximumf %5, %6 : vector<8x512xf32>
    %8 = arith.truncf %7 : vector<8x512xf32> to vector<8x512xbf16>
    %c0_6 = arith.constant 0 : index
    %c0_7 = arith.constant 0 : index
    %9 = vector.load %arg4[%c0_6, %c0_7] : memref<512x256xbf16, #tpu.memory_space<vmem>>, vector<512x256xbf16>
    %cst_8 = arith.constant dense<0.000000e+00> : vector<8x256xf32>
    %10 = tpu.matmul %8, %9, %cst_8 {dimension_numbers = #tpu.dot_dimension_numbers<[1], [0], [0], [1], [0, 0, 1, 1], [], []>} : vector<8x512xbf16>, vector<512x256xbf16>, vector<8x256xf32> -> vector<8x256xf32>
    %c0_9 = arith.constant 0 : index
    %c0_10 = arith.constant 0 : index
    %11 = vector.load %arg5[%c0_9, %c0_10] : memref<1x256xf32, #tpu.memory_space<vmem>>, vector<1x256xf32>
    %12 = vector.broadcast %11 : vector<1x256xf32> to vector<8x256xf32>
    %13 = arith.addf %10, %12 : vector<8x256xf32>
    %cst_11 = arith.constant 0.000000e+00 : f32
    %14 = vector.broadcast %cst_11 : f32 to vector<8x256xf32>
    %15 = arith.maximumf %13, %14 : vector<8x256xf32>
    %16 = arith.truncf %15 : vector<8x256xf32> to vector<8x256xbf16>
    %c0_12 = arith.constant 0 : index
    %c0_13 = arith.constant 0 : index
    %17 = vector.load %arg6[%c0_12, %c0_13] : memref<256x128xbf16, #tpu.memory_space<vmem>>, vector<256x128xbf16>
    %cst_14 = arith.constant dense<0.000000e+00> : vector<8x128xf32>
    %18 = tpu.matmul %16, %17, %cst_14 {dimension_numbers = #tpu.dot_dimension_numbers<[1], [0], [0], [1], [0, 0, 1, 1], [], []>} : vector<8x256xbf16>, vector<256x128xbf16>, vector<8x128xf32> -> vector<8x128xf32>
    %c0_15 = arith.constant 0 : index
    %c0_16 = arith.constant 0 : index
    %19 = vector.load %arg7[%c0_15, %c0_16] : memref<1x128xf32, #tpu.memory_space<vmem>>, vector<1x128xf32>
    %20 = vector.broadcast %19 : vector<1x128xf32> to vector<8x128xf32>
    %21 = arith.addf %18, %20 : vector<8x128xf32>
    %cst_17 = arith.constant 0.000000e+00 : f32
    %22 = vector.broadcast %cst_17 : f32 to vector<8x128xf32>
    %23 = arith.maximumf %21, %22 : vector<8x128xf32>
    %24 = arith.truncf %23 : vector<8x128xf32> to vector<8x128xbf16>
    %c0_18 = arith.constant 0 : index
    %c0_19 = arith.constant 0 : index
    %25 = vector.load %arg8[%c0_18, %c0_19] : memref<128x64xbf16, #tpu.memory_space<vmem>>, vector<128x64xbf16>
    %cst_20 = arith.constant dense<0.000000e+00> : vector<8x64xf32>
    %26 = tpu.matmul %24, %25, %cst_20 {dimension_numbers = #tpu.dot_dimension_numbers<[1], [0], [0], [1], [0, 0, 1, 1], [], []>} : vector<8x128xbf16>, vector<128x64xbf16>, vector<8x64xf32> -> vector<8x64xf32>
    %c0_21 = arith.constant 0 : index
    %c0_22 = arith.constant 0 : index
    %27 = vector.load %arg9[%c0_21, %c0_22] : memref<1x64xf32, #tpu.memory_space<vmem>>, vector<1x64xf32>
    %28 = vector.broadcast %27 : vector<1x64xf32> to vector<8x64xf32>
    %29 = arith.addf %26, %28 : vector<8x64xf32>
    %cst_23 = arith.constant 0.000000e+00 : f32
    %30 = vector.broadcast %cst_23 : f32 to vector<8x64xf32>
    %31 = arith.maximumf %29, %30 : vector<8x64xf32>
    %c0_24 = arith.constant 0 : index
    %c0_25 = arith.constant 0 : index
    %32 = vector.load %arg10[%c0_24, %c0_25] : memref<1x64xf32, #tpu.memory_space<vmem>>, vector<1x64xf32>
    %33 = vector.broadcast %32 : vector<1x64xf32> to vector<8x64xf32>
    %34 = arith.mulf %31, %33 : vector<8x64xf32>
    %cst_26 = arith.constant dense<0.000000e+00> : vector<8xf32>
    %35 = vector.multi_reduction <add>, %34, %cst_26 [1] : vector<8x64xf32> to vector<8xf32>
    %36 = vector.shape_cast %35 : vector<8xf32> to vector<8x1xf32>
    %c0_27 = arith.constant 0 : index
    %c0_28 = arith.constant 0 : index
    %37 = vector.load %arg11[%c0_27, %c0_28] : memref<1x1xf32, #tpu.memory_space<vmem>>, vector<1x1xf32>
    %38 = vector.broadcast %37 : vector<1x1xf32> to vector<8x1xf32>
    %39 = arith.addf %36, %38 : vector<8x1xf32>
    %c0_29 = arith.constant 0 : index
    %c0_30 = arith.constant 0 : index
    %40 = vector.load %arg12[%c0_29, %c0_30] : memref<8x1xf32, #tpu.memory_space<vmem>>, vector<8x1xf32>
    tpu.vector_store %arg12[%c0_29, %c0_30], %39 {strides = array<i32>} : memref<8x1xf32, #tpu.memory_space<vmem>>, vector<8x1xf32>,
    return
  }
  func.func @transform_0(%arg0: i32) -> (i32, i32) {
    %c0_i32 = arith.constant 0 : i32
    %c0_i32_0 = arith.constant 0 : i32
    return %arg0, %c0_i32 : i32, i32
  }
  func.func @transform_1(%arg0: i32) -> (i32, i32) {
    %c0_i32 = arith.constant 0 : i32
    %c0_i32_0 = arith.constant 0 : i32
    %c0_i32_1 = arith.constant 0 : i32
    return %c0_i32, %c0_i32_0 : i32, i32
  }
  func.func @transform_2(%arg0: i32) -> (i32, i32) {
    %c0_i32 = arith.constant 0 : i32
    %c0_i32_0 = arith.constant 0 : i32
    %c0_i32_1 = arith.constant 0 : i32
    return %c0_i32, %c0_i32_0 : i32, i32
  }
  func.func @transform_3(%arg0: i32) -> (i32, i32) {
    %c0_i32 = arith.constant 0 : i32
    %c0_i32_0 = arith.constant 0 : i32
    %c0_i32_1 = arith.constant 0 : i32
    return %c0_i32, %c0_i32_0 : i32, i32
  }
  func.func @transform_4(%arg0: i32) -> (i32, i32) {
    %c0_i32 = arith.constant 0 : i32
    %c0_i32_0 = arith.constant 0 : i32
    %c0_i32_1 = arith.constant 0 : i32
    return %c0_i32, %c0_i32_0 : i32, i32
  }
  func.func @transform_5(%arg0: i32) -> (i32, i32) {
    %c0_i32 = arith.constant 0 : i32
    %c0_i32_0 = arith.constant 0 : i32
    %c0_i32_1 = arith.constant 0 : i32
    return %c0_i32, %c0_i32_0 : i32, i32
  }
  func.func @transform_6(%arg0: i32) -> (i32, i32) {
    %c0_i32 = arith.constant 0 : i32
    %c0_i32_0 = arith.constant 0 : i32
    %c0_i32_1 = arith.constant 0 : i32
    return %c0_i32, %c0_i32_0 : i32, i32
  }
  func.func @transform_7(%arg0: i32) -> (i32, i32) {
    %c0_i32 = arith.constant 0 : i32
    %c0_i32_0 = arith.constant 0 : i32
    %c0_i32_1 = arith.constant 0 : i32
    return %c0_i32, %c0_i32_0 : i32, i32
  }
  func.func @transform_8(%arg0: i32) -> (i32, i32) {
    %c0_i32 = arith.constant 0 : i32
    %c0_i32_0 = arith.constant 0 : i32
    %c0_i32_1 = arith.constant 0 : i32
    return %c0_i32, %c0_i32_0 : i32, i32
  }
  func.func @transform_9(%arg0: i32) -> (i32, i32) {
    %c0_i32 = arith.constant 0 : i32
    %c0_i32_0 = arith.constant 0 : i32
    %c0_i32_1 = arith.constant 0 : i32
    return %c0_i32, %c0_i32_0 : i32, i32
  }
  func.func @transform_10(%arg0: i32) -> (i32, i32) {
    %c0_i32 = arith.constant 0 : i32
    %c0_i32_0 = arith.constant 0 : i32
    %c0_i32_1 = arith.constant 0 : i32
    return %c0_i32, %c0_i32_0 : i32, i32
  }
  func.func @transform_11(%arg0: i32) -> (i32, i32) {
    %c0_i32 = arith.constant 0 : i32
    %c0_i32_0 = arith.constant 0 : i32
    return %arg0, %c0_i32 : i32, i32
  }
}

</mosaic_0001>

<bundles_post_ra>
// kernel: tpu_custom_call.1
= control target key start
LH: loop header
LB: loop body
LE: loop exit
PB: predicated region body
PF: predicated region fallthrough
CT: control target
= control target key end

     0   :  { %s1682_s0 = inlined_call_operand.vmem [shape: bf16[8,32], index: 0, kind: input, shape index: {}]   ;;  %s1683_s1 = inlined_call_operand.vmem [shape: bf16[32,512], index: 1, kind: input, shape index: {}]   ;;  %s1684_s2 = inlined_call_operand.vmem [shape: f32[1,512], index: 2, kind: input, shape index: {}]   ;;  %s1685_s3 = inlined_call_operand.hbm [shape: bf16[512,256], index: 3, kind: input, shape index: {}]   ;;  %s1686_s4 = inlined_call_operand.vmem [shape: f32[1,256], index: 4, kind: input, shape index: {}]   ;;  %s1687_s5 = inlined_call_operand.hbm [shape: bf16[256,128], index: 5, kind: input, shape index: {}]   ;;  %s1688_s6 = inlined_call_operand.vmem [shape: f32[1,128], index: 6, kind: input, shape index: {}]   ;;  %s1689_s7 = inlined_call_operand.vmem [shape: bf16[128,64], index: 7, kind: input, shape index: {}]   ;;  %s1690_s8 = inlined_call_operand.vmem [shape: f32[1,64], index: 8, kind: input, shape index: {}]   ;;  %s1691_s9 = inlined_call_operand.vmem [shape: f32[1,64], index: 9, kind: input, shape index: {}]   ;;  %s1692_s10 = inlined_call_operand.<no memory space> [shape: f32[1,1], index: 10, kind: input, shape index: {}]   ;;  %s1693_s11 = inlined_call_operand.vmem [shape: f32[8,1], index: 11, kind: output, shape index: {}]  }
   0x1   :  { %v16_v0 = vstv %s1692_s10 }
   0x2   :  { %17 = vst [vmem:[#allocation2] sm:$0x1] %v16_v0 }
   0x3   :  { %18 = vsyncpa [#allocation4], 0  ;;  %s30_s21 = sshll.u32 %s1685_s3, 4  ;;  %s31_s21 = int_to_ptr.hbm [resolvable:$true] %s30_s21 }
   0x4   :  { %19 = vsyncpa [#allocation6], 0  ;;  %s1504_s22 = smov [#allocation3]   ;;  %s45_s26 = sshll.u32 %s1687_s5, 4  ;;  %s46_s26 = int_to_ptr.hbm [resolvable:$true] %s45_s26 }
   0x5   :  { %s32_s23 = sshll.u32 %s1504_s22, 4  ;;  %s1505_s27 = smov 128   ;;  %s33_s23 = int_to_ptr.vmem [resolvable:$true] %s32_s23 }
   0x6   :  { %s1506_s28 = smov 8   ;;  %s1507_s10 = smov [#allocation5]  }
   0x7   :  { %38 = dma.hbm_to_vmem [thread:$0]  %s31_s21, 8192, %s33_s23, [#allocation4], %s1505_s27, %s1505_s27, %s1506_s28  }
   0x8   :  { %s47_s29 = sshll.u32 %s1507_s10, 4  ;;  %s1508_s30 = smov 64   ;;  %s48_s29 = int_to_ptr.vmem [resolvable:$true] %s47_s29 }
   0x9   :  { %s1509_s12 = smov 4  }
   0xa   :  { %53 = dma.hbm_to_vmem [thread:$0]  %s46_s26, 2048, %s48_s29, [#allocation6], %s1508_s30, %s1508_s30, %s1509_s12  }
   0xb   :  { %1500 = dma.done.wait [#allocation4], 8192  }
   0xc   :  { %1501 = vsyncadd [#allocation4], 4294959104 }
   0xd   :  { %1502 = dma.done.wait [#allocation6], 2048  }
   0xe   :  { %1503 = vsyncadd [#allocation6], 4294965248  ;;  %v976_v1 = vld [vmem:[%s1683_s1 + $0x20] sm:$0xf]  ;;  %v1352_v2 = vld [vmem:[%s1683_s1 + $0x2c] sm:$0xf0] }
   0xf   :  { %v1350_v3 = vld [vmem:[%s1683_s1 + $0x24] sm:$0xf]  ;;  %v977_v4 = vor.u32 %v1352_v2, %v976_v1  ;;  %v978_v5 = vld [vmem:[%s1683_s1 + $0x30] sm:$0xf0]  ;;  %v984_v6 = vld [vmem:[%s1683_s1 + $0x28] sm:$0xf] }
  0x10   :  { %v1353_v7 = vld [vmem:[%s1683_s1 + $0x34] sm:$0xf0]  ;;  %v981_v8 = vor.u32 %v1350_v3, %v978_v5  ;;  %v960_v10 = vld [vmem:[%s1683_s1] sm:$0xf]  ;;  %v1348_v11 = vld [vmem:[%s1683_s1 + $0xc] sm:$0xf0] }
  0x11   :  { %v985_v9 = vor.u32 %v1353_v7, %v984_v6  ;;  %v1346_v12 = vld [vmem:[%s1683_s1 + $0x4] sm:$0xf]  ;;  %142 = vmatpush.bf16.msra.mxu3 %v977_v4  ;;  %v961_v13 = vor.u32 %v1348_v11, %v960_v10  ;;  %v962_v14 = vld [vmem:[%s1683_s1 + $0x10] sm:$0xf0]  ;;  %v968_v15 = vld [vmem:[%s1683_s1 + $0x8] sm:$0xf] }
  0x12   :  { %v1349_v16 = vld [vmem:[%s1683_s1 + $0x14] sm:$0xf0]  ;;  %155 = vmatpush.bf16.msra.mxu1 %v981_v8  ;;  %v965_v17 = vor.u32 %v1346_v12, %v962_v14  ;;  %vm132_vm0 = vcmask 261120   ;;  %v1351_v19 = vld [vmem:[%s1683_s1 + $0x2c] sm:$0xf]  ;;  %vm941_vm1 = vcmask 523264  }
  0x13   :  { %168 = vmatpush.bf16.msra.mxu2 %v985_v9  ;;  %v969_v18 = vor.u32 %v1349_v16, %v968_v15  ;;  %v986_v20 = vld [vmem:[%s1683_s1 + $0x38] sm:$0xf0]  ;;  %v1624_v21 = vld [vmem:[%s1682_s0] sm:$0xf]  ;;  %v1347_v23 = vld [vmem:[%s1683_s1 + $0xc] sm:$0xf] }
  0x14   :  { %v989_v22 = vor.u32 %v1351_v19, %v986_v20  ;;  %v970_v24 = vld [vmem:[%s1683_s1 + $0x18] sm:$0xf0]  ;;  %v1116_v25 = vld [vmem:[#allocation3 + $0xf0] sm:$0xf]  ;;  %v1108_v27 = vld [vmem:[#allocation3 + $0xe0] sm:$0xf] }
  0x15   :  { %v1385_v26 = vld [vmem:[#allocation3 + $0xf4] sm:$0xf0]  ;;  %v1383_v28 = vld [vmem:[#allocation3 + $0xe4] sm:$0xf0]  ;;  %143 = vmatpush.bf16.msra.mxu3 %v961_v13  ;;  %v1052_v30 = vld [vmem:[#allocation3 + $0x70] sm:$0xf]  ;;  %v973_v35 = vor.u32 %v1347_v23, %v970_v24 }
  0x16   :  { %v1117_v29 = vor.u32 %v1385_v26, %v1116_v25  ;;  %v1369_v31 = vld [vmem:[#allocation3 + $0x74] sm:$0xf0]  ;;  %v1180_v32 = vld [vmem:[#allocation3 + $0x170] sm:$0xf]  ;;  %156 = vmatpush.bf16.msra.mxu1 %v965_v17  ;;  %v1109_v36 = vor.u32 %v1383_v28, %v1108_v27  ;;  %v1044_v38 = vld [vmem:[#allocation3 + $0x60] sm:$0xf] }
  0x17   :  { %169 = vmatpush.bf16.msra.mxu2 %v969_v18  ;;  %v1053_v33 = vor.u32 %v1369_v31, %v1052_v30  ;;  %v1401_v34 = vld [vmem:[#allocation3 + $0x174] sm:$0xf0]  ;;  %v1367_v39 = vld [vmem:[#allocation3 + $0x64] sm:$0xf0]  ;;  %v1172_v40 = vld [vmem:[#allocation3 + $0x160] sm:$0xf] }
  0x18   :  { %v1181_v37 = vor.u32 %v1401_v34, %v1180_v32  ;;  %990 = vmatmul.msk.bf16.vlgmr.msra.gmra.mxu3 %vm132_vm0, %v1624_v21  ;;  %v1100_v41 = vld [vmem:[#allocation3 + $0xd0] sm:$0xf]  ;;  %v1381_v42 = vld [vmem:[#allocation3 + $0xd4] sm:$0xf0]  ;;  %v1045_v43 = vor.u32 %v1367_v39, %v1044_v38  ;;  %v1399_v44 = vld [vmem:[#allocation3 + $0x164] sm:$0xf0] }
  0x19   :  { %181 = vmatpush.bf16.msrb.mxu3 %v989_v22  ;;  %586 = vmatpush.bf16.msra.mxu0 %v1053_v33  ;;  %v1036_v45 = vld [vmem:[#allocation3 + $0x50] sm:$0xf]  ;;  %v1365_v46 = vld [vmem:[#allocation3 + $0x54] sm:$0xf0]  ;;  %v1173_v47 = vor.u32 %v1399_v44, %v1172_v40  ;;  %v1101_v48 = vor.u32 %v1381_v42, %v1100_v41  ;;  %v1092_v51 = vld [vmem:[#allocation3 + $0xc0] sm:$0xf] }
  0x1a   :  { %599 = vmatpush.bf16.msrb.mxu1 %v1117_v29  ;;  %992 = vmatmul.msk.bf16.vlgmr.msra.gmra.mxu2 %vm132_vm0, %v1624_v21  ;;  %v1164_v49 = vld [vmem:[#allocation3 + $0x150] sm:$0xf]  ;;  %v1397_v50 = vld [vmem:[#allocation3 + $0x154] sm:$0xf0]  ;;  %v1379_v52 = vld [vmem:[#allocation3 + $0xc4] sm:$0xf0]  ;;  %v1037_v53 = vor.u32 %v1365_v46, %v1036_v45 }
  0x1b   :  { %991 = vmatmul.msk.bf16.vlgmr.msra.gmra.mxu1 %vm132_vm0, %v1624_v21  ;;  %612 = vmatpush.bf16.msrb.mxu2 %v1181_v37  ;;  %v1028_v54 = vld [vmem:[#allocation3 + $0x40] sm:$0xf]  ;;  %v1363_v55 = vld [vmem:[#allocation3 + $0x44] sm:$0xf0]  ;;  %v1165_v56 = vor.u32 %v1397_v50, %v1164_v49  ;;  %v1244_v57 = vld [vmem:[#allocation3 + $0x1f0] sm:$0xf]  ;;  %v1093_v59 = vor.u32 %v1379_v52, %v1092_v51 }
  0x1c   :  { %v1417_v58 = vld [vmem:[#allocation3 + $0x1f4] sm:$0xf0]  ;;  %v1156_v60 = vld [vmem:[#allocation3 + $0x140] sm:$0xf]  ;;  %v1395_v61 = vld [vmem:[#allocation3 + $0x144] sm:$0xf0]  ;;  %v1029_v1 = vor.u32 %v1363_v55, %v1028_v54 }
  0x1d   :  { %182 = vmatpush.bf16.msrb.mxu3 %v973_v35  ;;  %587 = vmatpush.bf16.msra.mxu0 %v1045_v43  ;;  %v1245_v62 = vor.u32 %v1417_v58, %v1244_v57  ;;  %v1084_v63 = vld [vmem:[#allocation3 + $0xb0] sm:$0xf]  ;;  %v1377_v0 = vld [vmem:[#allocation3 + $0xb4] sm:$0xf0]  ;;  %v1236_v4 = vld [vmem:[#allocation3 + $0x1e0] sm:$0xf]  ;;  %v1157_v6 = vor.u32 %v1395_v61, %v1156_v60 }
  0x1e   :  { %600 = vmatpush.bf16.msrb.mxu1 %v1109_v36  ;;  %v1020_v2 = vld [vmem:[#allocation3 + $0x30] sm:$0xf]  ;;  %v1361_v3 = vld [vmem:[#allocation3 + $0x34] sm:$0xf0]  ;;  %v1415_v5 = vld [vmem:[#allocation3 + $0x1e4] sm:$0xf0]  ;;  %v1085_v8 = vor.u32 %v1377_v0, %v1084_v63 }
  0x1f   :  { %613 = vmatpush.bf16.msrb.mxu2 %v1173_v47  ;;  %v1237_v7 = vor.u32 %v1415_v5, %v1236_v4  ;;  %v1076_v9 = vld [vmem:[#allocation3 + $0xa0] sm:$0xf]  ;;  %v1148_v10 = vld [vmem:[#allocation3 + $0x130] sm:$0xf]  ;;  %v1393_v11 = vld [vmem:[#allocation3 + $0x134] sm:$0xf0]  ;;  %v1021_v13 = vor.u32 %v1361_v3, %v1020_v2 }
  0x20   :  { %v1375_v12 = vld [vmem:[#allocation3 + $0xa4] sm:$0xf0]  ;;  %v1228_v14 = vld [vmem:[#allocation3 + $0x1d0] sm:$0xf]  ;;  %v1413_v15 = vld [vmem:[#allocation3 + $0x1d4] sm:$0xf0]  ;;  %v1149_v19 = vor.u32 %v1393_v11, %v1148_v10 }
  0x21   :  { %588 = vmatpush.bf16.msra.mxu0 %v1037_v53  ;;  %625 = vmatpush.bf16.msra.mxu3 %v1245_v62  ;;  %v1012_v16 = vld [vmem:[#allocation3 + $0x20] sm:$0xf]  ;;  %v1359_v17 = vld [vmem:[#allocation3 + $0x24] sm:$0xf0]  ;;  %v1229_v18 = vor.u32 %v1413_v15, %v1228_v14  ;;  %v1077_v22 = vor.u32 %v1375_v12, %v1076_v9  ;;  %v1068_v26 = vld [vmem:[#allocation3 + $0x90] sm:$0xf] }
  0x22   :  { %601 = vmatpush.bf16.msrb.mxu1 %v1101_v48  ;;  %v1140_v20 = vld [vmem:[#allocation3 + $0x120] sm:$0xf]  ;;  %v1391_v23 = vld [vmem:[#allocation3 + $0x124] sm:$0xf0]  ;;  %v1373_v27 = vld [vmem:[#allocation3 + $0x94] sm:$0xf0]  ;;  %v1013_v28 = vor.u32 %v1359_v17, %v1012_v16 }
  0x23   :  { %614 = vmatpush.bf16.msrb.mxu2 %v1165_v56  ;;  %v1220_v24 = vld [vmem:[#allocation3 + $0x1c0] sm:$0xf]  ;;  %v1411_v25 = vld [vmem:[#allocation3 + $0x1c4] sm:$0xf0]  ;;  %v1004_v29 = vld [vmem:[#allocation3 + $0x10] sm:$0xf]  ;;  %v1141_v32 = vor.u32 %v1391_v23, %v1140_v20  ;;  %v1069_v33 = vor.u32 %v1373_v27, %v1068_v26 }
  0x24   :  { %v1357_v30 = vld [vmem:[#allocation3 + $0x14] sm:$0xf0]  ;;  %v1221_v31 = vor.u32 %v1411_v25, %v1220_v24  ;;  %v1132_v34 = vld [vmem:[#allocation3 + $0x110] sm:$0xf]  ;;  %v1060_v36 = vld [vmem:[#allocation3 + $0x80] sm:$0xf] }
  0x25   :  { %589 = vmatpush.bf16.msra.mxu0 %v1029_v1  ;;  %626 = vmatpush.bf16.msra.mxu3 %v1237_v7  ;;  %v1389_v35 = vld [vmem:[#allocation3 + $0x114] sm:$0xf0]  ;;  %v1371_v37 = vld [vmem:[#allocation3 + $0x84] sm:$0xf0]  ;;  %v1384_v38 = vld [vmem:[#allocation3 + $0xf4] sm:$0xf]  ;;  %v1005_v39 = vor.u32 %v1357_v30, %v1004_v29 }
  0x26   :  { %602 = vmatpush.bf16.msrb.mxu1 %v1093_v59  ;;  %v996_v40 = vld [vmem:[#allocation3] sm:$0xf]  ;;  %v1355_v41 = vld [vmem:[#allocation3 + $0x4] sm:$0xf0]  ;;  %v1133_v42 = vor.u32 %v1389_v35, %v1132_v34  ;;  %v1368_v43 = vld [vmem:[#allocation3 + $0x74] sm:$0xf]  ;;  %v1061_v45 = vor.u32 %v1371_v37, %v1060_v36 }
  0x27   :  { %615 = vmatpush.bf16.msrb.mxu2 %v1157_v6  ;;  %v1054_v44 = vld [vmem:[#allocation3 + $0x78] sm:$0xf0]  ;;  %v1124_v46 = vld [vmem:[#allocation3 + $0x100] sm:$0xf]  ;;  %v1387_v47 = vld [vmem:[#allocation3 + $0x104] sm:$0xf0]  ;;  %v997_v49 = vor.u32 %v1355_v41, %v996_v40 }
  0x28   :  { %993 = vmatmul.msk.bf16.vlgmr.msrb.gmra.mxu3 %vm132_vm0, %v1624_v21  ;;  %v1118_v21 = vld [vmem:[#allocation3 + $0xf8] sm:$0xf0]  ;;  %v1400_v50 = vld [vmem:[#allocation3 + $0x174] sm:$0xf]  ;;  %v1382_v52 = vld [vmem:[#allocation3 + $0xe4] sm:$0xf]  ;;  %v1057_v54 = vor.u32 %v1368_v43, %v1054_v44  ;;  %v1125_v55 = vor.u32 %v1387_v47, %v1124_v46 }
  0x29   :  { %590 = vmatpush.bf16.msra.mxu0 %v1021_v13  ;;  %627 = vmatpush.bf16.msra.mxu3 %v1229_v18  ;;  %v1121_v48 = vor.u32 %v1384_v38, %v1118_v21  ;;  %v1182_v51 = vld [vmem:[#allocation3 + $0x178] sm:$0xf0]  ;;  %v1110_v53 = vld [vmem:[#allocation3 + $0xe8] sm:$0xf0]  ;;  %v1380_v58 = vld [vmem:[#allocation3 + $0xd4] sm:$0xf] }
  0x2a   :  { %603 = vmatpush.bf16.msrb.mxu1 %v1085_v8  ;;  %v1185_v56 = vor.u32 %v1400_v50, %v1182_v51  ;;  %v1113_v57 = vor.u32 %v1382_v52, %v1110_v53  ;;  %v1102_v59 = vld [vmem:[#allocation3 + $0xd8] sm:$0xf0]  ;;  %v1212_v61 = vld [vmem:[#allocation3 + $0x1b0] sm:$0xf]  ;;  %v1409_v62 = vld [vmem:[#allocation3 + $0x1b4] sm:$0xf0] }
  0x2b   :  { %616 = vmatpush.bf16.msrb.mxu2 %v1149_v19  ;;  %v1105_v60 = vor.u32 %v1380_v58, %v1102_v59  ;;  %v1213_v63 = vor.u32 %v1409_v62, %v1212_v61  ;;  %v1366_v0 = vld [vmem:[#allocation3 + $0x64] sm:$0xf]  ;;  %v1046_v1 = vld [vmem:[#allocation3 + $0x68] sm:$0xf0]  ;;  %v1204_v9 = vld [vmem:[#allocation3 + $0x1a0] sm:$0xf] }
  0x2c   :  { %v1398_v2 = vld [vmem:[#allocation3 + $0x164] sm:$0xf]  ;;  %v1049_v3 = vor.u32 %v1366_v0, %v1046_v1  ;;  %v1174_v4 = vld [vmem:[#allocation3 + $0x168] sm:$0xf0]  ;;  %v1407_v10 = vld [vmem:[#allocation3 + $0x1a4] sm:$0xf0] }
  0x2d   :  { %591 = vmatpush.bf16.msra.mxu0 %v1013_v28  ;;  %628 = vmatpush.bf16.msra.mxu3 %v1221_v31  ;;  %v1177_v5 = vor.u32 %v1398_v2, %v1174_v4  ;;  %v1378_v6 = vld [vmem:[#allocation3 + $0xc4] sm:$0xf]  ;;  %v1094_v7 = vld [vmem:[#allocation3 + $0xc8] sm:$0xf0]  ;;  %v1205_v11 = vor.u32 %v1407_v10, %v1204_v9  ;;  %v1364_v12 = vld [vmem:[#allocation3 + $0x54] sm:$0xf] }
  0x2e   :  { %604 = vmatpush.bf16.msrb.mxu1 %v1077_v22  ;;  %v1097_v8 = vor.u32 %v1378_v6, %v1094_v7  ;;  %v1038_v13 = vld [vmem:[#allocation3 + $0x58] sm:$0xf0]  ;;  %v1396_v14 = vld [vmem:[#allocation3 + $0x154] sm:$0xf]  ;;  %v1196_v22 = vld [vmem:[#allocation3 + $0x190] sm:$0xf] }
  0x2f   :  { %617 = vmatpush.bf16.msrb.mxu2 %v1141_v32  ;;  %v1041_v15 = vor.u32 %v1364_v12, %v1038_v13  ;;  %v1166_v16 = vld [vmem:[#allocation3 + $0x158] sm:$0xf0]  ;;  %v1376_v18 = vld [vmem:[#allocation3 + $0xb4] sm:$0xf]  ;;  %v1405_v23 = vld [vmem:[#allocation3 + $0x194] sm:$0xf0] }
  0x30   :  { %v1169_v17 = vor.u32 %v1396_v14, %v1166_v16  ;;  %v1086_v19 = vld [vmem:[#allocation3 + $0xb8] sm:$0xf0]  ;;  %v1197_v24 = vor.u32 %v1405_v23, %v1196_v22  ;;  %v1362_v25 = vld [vmem:[#allocation3 + $0x44] sm:$0xf]  ;;  %v1030_v26 = vld [vmem:[#allocation3 + $0x48] sm:$0xf0] }
  0x31   :  { %592 = vmatpush.bf16.msra.mxu0 %v1005_v39  ;;  %629 = vmatpush.bf16.msra.mxu3 %v1213_v63  ;;  %v1089_v20 = vor.u32 %v1376_v18, %v1086_v19  ;;  %v1394_v27 = vld [vmem:[#allocation3 + $0x144] sm:$0xf]  ;;  %v1033_v28 = vor.u32 %v1362_v25, %v1030_v26  ;;  %v1158_v29 = vld [vmem:[#allocation3 + $0x148] sm:$0xf0]  ;;  %v1188_v34 = vld [vmem:[#allocation3 + $0x180] sm:$0xf] }
  0x32   :  { %605 = vmatpush.bf16.msrb.mxu1 %v1069_v33  ;;  %v1161_v30 = vor.u32 %v1394_v27, %v1158_v29  ;;  %v1374_v31 = vld [vmem:[#allocation3 + $0xa4] sm:$0xf]  ;;  %v1078_v32 = vld [vmem:[#allocation3 + $0xa8] sm:$0xf0]  ;;  %v1403_v35 = vld [vmem:[#allocation3 + $0x184] sm:$0xf0] }
  0x33   :  { %618 = vmatpush.bf16.msrb.mxu2 %v1133_v42  ;;  %v1081_v33 = vor.u32 %v1374_v31, %v1078_v32  ;;  %v1189_v36 = vor.u32 %v1403_v35, %v1188_v34  ;;  %v1360_v37 = vld [vmem:[#allocation3 + $0x34] sm:$0xf]  ;;  %v1022_v38 = vld [vmem:[#allocation3 + $0x38] sm:$0xf0]  ;;  %v1358_v47 = vld [vmem:[#allocation3 + $0x24] sm:$0xf] }
  0x34   :  { %v1392_v39 = vld [vmem:[#allocation3 + $0x134] sm:$0xf]  ;;  %v1025_v21 = vor.u32 %v1360_v37, %v1022_v38  ;;  %v1150_v40 = vld [vmem:[#allocation3 + $0x138] sm:$0xf0]  ;;  %v1390_v50 = vld [vmem:[#allocation3 + $0x124] sm:$0xf] }
  0x35   :  { %593 = vmatpush.bf16.msra.mxu0 %v997_v49  ;;  %630 = vmatpush.bf16.msra.mxu3 %v1205_v11  ;;  %v1416_v41 = vld [vmem:[#allocation3 + $0x1f4] sm:$0xf]  ;;  %v1246_v42 = vld [vmem:[#allocation3 + $0x1f8] sm:$0xf0]  ;;  %v1153_v43 = vor.u32 %v1392_v39, %v1150_v40  ;;  %v1014_v49 = vld [vmem:[#allocation3 + $0x28] sm:$0xf0] }
  0x36   :  { %606 = vmatpush.bf16.msrb.mxu1 %v1061_v45  ;;  %v1249_v44 = vor.u32 %v1416_v41, %v1246_v42  ;;  %v1372_v45 = vld [vmem:[#allocation3 + $0x94] sm:$0xf]  ;;  %v1070_v46 = vld [vmem:[#allocation3 + $0x98] sm:$0xf0]  ;;  %v1142_v51 = vld [vmem:[#allocation3 + $0x128] sm:$0xf0]  ;;  %v1017_v52 = vor.u32 %v1358_v47, %v1014_v49 }
  0x37   :  { %619 = vmatpush.bf16.msrb.mxu2 %v1125_v55  ;;  %v1145_v53 = vor.u32 %v1390_v50, %v1142_v51  ;;  %v1238_v55 = vld [vmem:[#allocation3 + $0x1e8] sm:$0xf0]  ;;  %v1006_v61 = vld [vmem:[#allocation3 + $0x18] sm:$0xf0]  ;;  %v1388_v62 = vld [vmem:[#allocation3 + $0x114] sm:$0xf] }
  0x38   :  { %v1062_v58 = vld [vmem:[#allocation3 + $0x88] sm:$0xf0]  ;;  %v1134_v0 = vld [vmem:[#allocation3 + $0x118] sm:$0xf0]  ;;  %v1412_v1 = vld [vmem:[#allocation3 + $0x1d4] sm:$0xf] }
  0x39   :  { %638 = vmatpush.bf16.msrb.mxu0 %v1057_v54  ;;  %631 = vmatpush.bf16.msra.mxu3 %v1197_v24  ;;  %v1414_v54 = vld [vmem:[#allocation3 + $0x1e4] sm:$0xf]  ;;  %v1230_v2 = vld [vmem:[#allocation3 + $0x1d8] sm:$0xf0]  ;;  %v998_v6 = vld [vmem:[#allocation3 + $0x8] sm:$0xf0] }
  0x3a   :  { %651 = vmatpush.bf16.msra.mxu1 %v1121_v48  ;;  %v1073_v48 = vor.u32 %v1372_v45, %v1070_v46  ;;  %v1233_v4 = vor.u32 %v1412_v1, %v1230_v2  ;;  %v1386_v7 = vld [vmem:[#allocation3 + $0x104] sm:$0xf]  ;;  %v1126_v9 = vld [vmem:[#allocation3 + $0x108] sm:$0xf0]  ;;  %v82_v14 = vld [vmem:[%s1684_s2] sm:$0xf] }
  0x3b   :  { %664 = vmatpush.bf16.msra.mxu2 %v1185_v56  ;;  %v1370_v56 = vld [vmem:[#allocation3 + $0x84] sm:$0xf]  ;;  %v1222_v11 = vld [vmem:[#allocation3 + $0x1c8] sm:$0xf0]  ;;  %v1129_v12 = vor.u32 %v1386_v7, %v1126_v9  ;;  %v1214_v16 = vld [vmem:[#allocation3 + $0x1b8] sm:$0xf0] }
  0x3c   :  { %v1065_v59 = vor.u32 %v1370_v56, %v1062_v58  ;;  %v1410_v10 = vld [vmem:[#allocation3 + $0x1c4] sm:$0xf]  ;;  %v85_v18 = vperm.slane %v82_v14, 1  ;;  %v1404_v24 = vld [vmem:[#allocation3 + $0x194] sm:$0xf]  ;;  %v84_v27 = vperm.slane %v82_v14, 0 }
  0x3d   :  { %639 = vmatpush.bf16.msrb.mxu0 %v1049_v3  ;;  %632 = vmatpush.bf16.msra.mxu3 %v1189_v36  ;;  %v1137_v3 = vor.u32 %v1388_v62, %v1134_v0  ;;  %v1225_v13 = vor.u32 %v1410_v10, %v1222_v11  ;;  %v1406_v19 = vld [vmem:[#allocation3 + $0x1a4] sm:$0xf]  ;;  %v1198_v25 = vld [vmem:[#allocation3 + $0x198] sm:$0xf0]  ;;  %v86_v29 = vperm.slane %v82_v14, 2  ;;  %v87_v45 = vperm.slane %v82_v14, 3 }
  0x3e   :  { %652 = vmatpush.bf16.msra.mxu1 %v1113_v57  ;;  %v1241_v57 = vor.u32 %v1414_v54, %v1238_v55  ;;  %v1402_v31 = vld [vmem:[#allocation3 + $0x184] sm:$0xf]  ;;  %v1190_v32 = vld [vmem:[#allocation3 + $0x188] sm:$0xf0]  ;;  %v1425_v51 = vld [vmem:[#allocation5 + $0x38] sm:$0xff]  ;;  %vm950_vm2 = vcmask 7168  }
  0x3f   :  { %665 = vmatpush.bf16.msra.mxu2 %v1177_v5  ;;  %v1354_v5 = vld [vmem:[#allocation3 + $0x4] sm:$0xf]  ;;  %v1193_v38 = vor.u32 %v1402_v31, %v1190_v32  ;;  %v1421_v55 = vld [vmem:[#allocation5 + $0x18] sm:$0xff]  ;;  %v1432_v58 = vld [vmem:[#allocation5 + $0x70] sm:$0xff] }
  0x40   :  { %v1422_v54 = vld [vmem:[#allocation5 + $0x20] sm:$0xff]  ;;  %v1433_v56 = vld [vmem:[#allocation5 + $0x78] sm:$0xff]  ;;  %v1428_v1 = vld [vmem:[#allocation5 + $0x50] sm:$0xff] }
  0x41   :  { %640 = vmatpush.bf16.msrb.mxu0 %v1041_v15  ;;  %677 = vmatpush.bf16.msrb.mxu3 %v1249_v44  ;;  %v1408_v15 = vld [vmem:[#allocation3 + $0x1b4] sm:$0xf]  ;;  %v1430_v62 = vld [vmem:[#allocation5 + $0x60] sm:$0xff]  ;;  %v1429_v0 = vld [vmem:[#allocation5 + $0x58] sm:$0xff] }
  0x42   :  { %653 = vmatpush.bf16.msra.mxu1 %v1105_v60  ;;  %v1356_v60 = vld [vmem:[#allocation3 + $0x14] sm:$0xf] }
  0x43   :  { %666 = vmatpush.bf16.msra.mxu2 %v1169_v17  ;;  %v1009_v63 = vor.u32 %v1356_v60, %v1006_v61  ;;  %v1217_v17 = vor.u32 %v1408_v15, %v1214_v16  ;;  %v1431_v60 = vld [vmem:[#allocation5 + $0x68] sm:$0xff]  ;;  %v1418_v61 = vld [vmem:[#allocation5] sm:$0xff]  ;;  %v1441_v11 = vld [vmem:[%s1689_s7 + $0x38] sm:$0xff] }
  0x44   :  { %v1440_v15 = vld [vmem:[%s1689_s7 + $0x30] sm:$0xff] }
  0x45   :  { %641 = vmatpush.bf16.msrb.mxu0 %v1033_v28  ;;  %678 = vmatpush.bf16.msrb.mxu3 %v1241_v57  ;;  %v1420_v57 = vld [vmem:[#allocation5 + $0x10] sm:$0xff] }
  0x46   :  { %654 = vmatpush.bf16.msra.mxu1 %v1097_v8  ;;  %v1001_v8 = vor.u32 %v1354_v5, %v998_v6  ;;  %v260_v6 = vld [vmem:[%s1686_s4] sm:$0x3] }
  0x47   :  { %667 = vmatpush.bf16.msra.mxu2 %v1161_v30  ;;  %v1201_v30 = vor.u32 %v1404_v24, %v1198_v25  ;;  %v262_v9 = vperm.slane %v260_v6, 0  ;;  %v263_v25 = vperm.slane %v260_v6, 1 }
  0x49   :  { %642 = vmatpush.bf16.msrb.mxu0 %v1025_v21  ;;  %679 = vmatpush.bf16.msrb.mxu3 %v1233_v4  ;;  %v1427_v4 = vld [vmem:[#allocation5 + $0x48] sm:$0xff] }
  0x4a   :  { %655 = vmatpush.bf16.msra.mxu1 %v1089_v20  ;;  %v1206_v20 = vld [vmem:[#allocation3 + $0x1a8] sm:$0xf0] }
  0x4b   :  { %668 = vmatpush.bf16.msra.mxu2 %v1153_v43  ;;  %v1209_v22 = vor.u32 %v1406_v19, %v1206_v20 }
  0x4d   :  { %643 = vmatpush.bf16.msrb.mxu0 %v1017_v52  ;;  %680 = vmatpush.bf16.msrb.mxu3 %v1225_v13  ;;  %v1424_v52 = vld [vmem:[#allocation5 + $0x30] sm:$0xff] }
  0x4e   :  { %656 = vmatpush.bf16.msra.mxu1 %v1081_v33 }
  0x4f   :  { %669 = vmatpush.bf16.msra.mxu2 %v1145_v53  ;;  %v1423_v53 = vld [vmem:[#allocation5 + $0x28] sm:$0xff] }
  0x51   :  { %644 = vmatpush.bf16.msrb.mxu0 %v1009_v63  ;;  %681 = vmatpush.bf16.msrb.mxu3 %v1217_v17 }
  0x52   :  { %657 = vmatpush.bf16.msra.mxu1 %v1073_v48 }
  0x53   :  { %670 = vmatpush.bf16.msra.mxu2 %v1137_v3 }
  0x55   :  { %645 = vmatpush.bf16.msrb.mxu0 %v1001_v8  ;;  %682 = vmatpush.bf16.msrb.mxu3 %v1209_v22  ;;  %v1426_v8 = vld [vmem:[#allocation5 + $0x40] sm:$0xff] }
  0x56   :  { %658 = vmatpush.bf16.msra.mxu1 %v1065_v59  ;;  %v1419_v59 = vld [vmem:[#allocation5 + $0x8] sm:$0xff] }
  0x57   :  { %671 = vmatpush.bf16.msra.mxu2 %v1129_v12 }
  0x59   :  { %683 = vmatpush.bf16.msrb.mxu3 %v1201_v30 }
  0x5d   :  { %684 = vmatpush.bf16.msrb.mxu3 %v1193_v38  ;;  %v1438_v38 = vld [vmem:[%s1689_s7 + $0x20] sm:$0xff] }
  0x98   :  { %v158_v23 = vpop.f32.mrf.mxu1 }
  0x99   :  { %v159_v26 = vadd.f32 %v158_v23, %v85_v18 }
  0x9b   :  { %v189_v28 = vmax.f32 %v159_v26, 0.0  ;;  %v145_v34 = vpop.f32.mrf.mxu3 }
  0x9c   :  { %v146_v35 = vadd.f32 %v145_v34, %v84_v27 }
  0x9d   :  { %v193_v33 = vpack.c.bf16 %v189_v28, %v189_v28  ;;  %v171_v36 = vpop.f32.mrf.mxu2 }
  0x9e   :  { %v172_v37 = vadd.f32 %v171_v36, %v86_v29  ;;  %v188_v39 = vmax.f32 %v146_v35, 0.0 }
  0x9f   :  { %607 = vmatmul.bf16.vlgmr.msrb.gmra.mxu1 %v193_v33 }
  0xa0   :  { %v160_v21 = vpop.f32.mrf.mxu1  ;;  %v190_v40 = vmax.f32 %v172_v37, 0.0  ;;  %v192_v41 = vpack.c.bf16 %v188_v39, %v188_v39  ;;  %839 = vmatpush.bf16.msrb.mxu1 %v1433_v56  ;;  %v1439_v37 = vld [vmem:[%s1689_s7 + $0x28] sm:$0xff]  ;;  %v1437_v39 = vld [vmem:[%s1689_s7 + $0x18] sm:$0xff] }
  0xa1   :  { %v1436_v21 = vld [vmem:[%s1689_s7 + $0x10] sm:$0xff] }
  0xa2   :  { %v194_v42 = vpack.c.bf16 %v190_v40, %v190_v40  ;;  %594 = vmatmul.bf16.vlgmr.msra.gmra.mxu0 %v192_v41  ;;  %v1435_v40 = vld [vmem:[%s1689_s7 + $0x8] sm:$0xff] }
  0xa3   :  { %v147_v43 = vpop.f32.mrf.mxu3  ;;  %826 = vmatpush.bf16.msra.mxu0 %v1425_v51  ;;  %v1449_v51 = vld [vmem:[%s1690_s8] ss:$0 sm:$0xff] }
  0xa4   :  { %620 = vmatmul.bf16.vlgmr.msrb.gmra.mxu2 %v194_v42  ;;  %840 = vmatpush.bf16.msrb.mxu1 %v1432_v58 }
  0xa5   :  { %v173_v44 = vpop.f32.mrf.mxu2  ;;  %922 = vmatpush.bf16.msrb.mxu2 %v1441_v11 }
  0xa6   :  { %v1448_v44 = vld [vmem:[%s1688_s6] ss:$0 sm:$0xff] }
  0xa7   :  { %827 = vmatpush.bf16.msra.mxu0 %v1424_v52 }
  0xa8   :  { %841 = vmatpush.bf16.msrb.mxu1 %v1431_v60 }
  0xa9   :  { %923 = vmatpush.bf16.msrb.mxu2 %v1440_v15 }
  0xab   :  { %v184_v46 = vpop.f32.mrf.mxu3  ;;  %828 = vmatpush.bf16.msra.mxu0 %v1423_v53 }
  0xac   :  { %v185_v47 = vadd.f32 %v184_v46, %v87_v45  ;;  %842 = vmatpush.bf16.msrb.mxu1 %v1430_v62 }
  0xad   :  { %924 = vmatpush.bf16.msrb.mxu2 %v1439_v37 }
  0xae   :  { %v191_v48 = vmax.f32 %v185_v47, 0.0 }
  0xaf   :  { %659 = vmatmul.bf16.vlgmr.msra.gmra.mxu1 %v193_v33  ;;  %829 = vmatpush.bf16.msra.mxu0 %v1422_v54  ;;  %v1450_v54 = vld [vmem:[%s1691_s9] ss:$0 sm:$0xff] }
  0xb0   :  { %v195_v49 = vpack.c.bf16 %v191_v48, %v191_v48  ;;  %843 = vmatpush.bf16.msrb.mxu1 %v1429_v0 }
  0xb1   :  { %925 = vmatpush.bf16.msrb.mxu2 %v1438_v38 }
  0xb2   :  { %633 = vmatmul.bf16.vlgmr.msra.gmra.mxu3 %v195_v49  ;;  %646 = vmatmul.bf16.vlgmr.msrb.gmra.mxu0 %v192_v41  ;;  %v1434_v41 = vld [vmem:[%s1689_s7] sm:$0xff] }
  0xb3   :  { %v186_v50 = vpop.f32.mrf.mxu3  ;;  %830 = vmatpush.bf16.msra.mxu0 %v1421_v55 }
  0xb4   :  { %672 = vmatmul.bf16.vlgmr.msra.gmra.mxu2 %v194_v42  ;;  %844 = vmatpush.bf16.msrb.mxu1 %v1428_v1 }
  0xb5   :  { %926 = vmatpush.bf16.msrb.mxu2 %v1437_v39 }
  0xb7   :  { %831 = vmatpush.bf16.msra.mxu0 %v1420_v57 }
  0xb8   :  { %845 = vmatpush.bf16.msrb.mxu1 %v1427_v4 }
  0xb9   :  { %927 = vmatpush.bf16.msrb.mxu2 %v1436_v21 }
  0xbb   :  { %832 = vmatpush.bf16.msra.mxu0 %v1419_v59  ;;  %v1451_v59 = vld [vmem:[#allocation2] ss:$0 sm:$0xff] }
  0xbc   :  { %846 = vmatpush.bf16.msrb.mxu1 %v1426_v8 }
  0xbd   :  { %928 = vmatpush.bf16.msrb.mxu2 %v1435_v40 }
  0xbf   :  { %833 = vmatpush.bf16.msra.mxu0 %v1418_v61 }
  0xc1   :  { %929 = vmatpush.bf16.msrb.mxu2 %v1434_v41 }
  0xc2   :  { %685 = vmatmul.bf16.vlgmr.msrb.gmra.mxu3 %v195_v49 }
 0x11c   :  { %v608_v63 = vpop.f32.mrf.mxu1 }
 0x11f   :  { %v595_v2 = vpop.f32.mrf.mxu0 }
 0x120   :  { %v596_v12 = vadd.f32 %v595_v2, %v262_v9 }
 0x122   :  { %v609_v16 = vadd.f32 %v608_v63, %v596_v12 }
 0x124   :  { %v610_v3 = vpop.f32.mrf.mxu1 }
 0x127   :  { %v621_v5 = vpop.f32.mrf.mxu2  ;;  %v597_v7 = vpop.f32.mrf.mxu0 }
 0x128   :  { %v622_v18 = vadd.f32 %v621_v5, %v609_v16 }
 0x12c   :  { %v660_v10 = vpop.f32.mrf.mxu1 }
 0x12f   :  { %v623_v13 = vpop.f32.mrf.mxu2  ;;  %v647_v14 = vpop.f32.mrf.mxu0 }
 0x130   :  { %v648_v28 = vadd.f32 %v647_v14, %v263_v25 }
 0x132   :  { %v661_v30 = vadd.f32 %v660_v10, %v648_v28 }
 0x134   :  { %v662_v17 = vpop.f32.mrf.mxu1 }
 0x135   :  { %v634_v19 = vpop.f32.mrf.mxu3 }
 0x136   :  { %v635_v20 = vadd.f32 %v634_v19, %v622_v18 }
 0x137   :  { %v673_v22 = vpop.f32.mrf.mxu2  ;;  %v649_v23 = vpop.f32.mrf.mxu0 }
 0x138   :  { %v690_v24 = vmax.f32 %v635_v20, 0.0  ;;  %v674_v31 = vadd.f32 %v673_v22, %v661_v30 }
 0x13a   :  { %v692_v26 = vpack.c.bf16 %v690_v24, %v690_v24 }
 0x13c   :  { %834 = vmatmul.bf16.vlgmr.msra.gmra.mxu0 %v692_v26 }
 0x13d   :  { %v636_v27 = vpop.f32.mrf.mxu3 }
 0x13f   :  { %v675_v29 = vpop.f32.mrf.mxu2 }
 0x145   :  { %v686_v32 = vpop.f32.mrf.mxu3 }
 0x146   :  { %v687_v33 = vadd.f32 %v686_v32, %v674_v31 }
 0x148   :  { %v691_v34 = vmax.f32 %v687_v33, 0.0 }
 0x14a   :  { %v693_v35 = vpack.c.bf16 %v691_v34, %v691_v34 }
 0x14c   :  { %847 = vmatmul.bf16.vlgmr.msrb.gmra.mxu1 %v693_v35 }
 0x14d   :  { %v688_v36 = vpop.f32.mrf.mxu3 }
 0x1b9   :  { %v835_v42 = vpop.f32.mrf.mxu0 }
 0x1ba   :  { %v836_v45 = vadd.f32 %v1448_v44, %v835_v42 }
 0x1c1   :  { %v837_v43 = vpop.f32.mrf.mxu0 }
 0x1c9   :  { %v848_v46 = vpop.f32.mrf.mxu1 }
 0x1ca   :  { %v849_v47 = vadd.f32 %v848_v46, %v836_v45 }
 0x1cc   :  { %v852_v48 = vmax.f32 %v849_v47, 0.0 }
 0x1ce   :  { %v853_v49 = vpack.c.bf16 %v852_v48, %v852_v48 }
 0x1d0   :  { %930 = vmatmul.bf16.vlgmr.msrb.gmra.mxu2 %v853_v49 }
 0x1d1   :  { %v850_v50 = vpop.f32.mrf.mxu1 }
 0x253   :  { %v931_v52 = vpop.f32.mrf.mxu2 }
 0x254   :  { %v932_v53 = vadd.f32 %v1449_v51, %v931_v52 }
 0x256   :  { %v935_v55 = vmax.f32 %v932_v53, 0.0 }
 0x258   :  { %v940_v56 = vmul.f32 %v1450_v54, %v935_v55 }
 0x25a   :  { %v942_v57 = vsel %vm941_vm1, %v940_v56, 0.0 }
 0x25b   :  { %v933_v58 = vpop.f32.mrf.mxu2  ;;  %943 = vadd.xlane.f32.xlu0 %v942_v57 }
 0x2ce   :  { %v944_v60 = vpop.xlane.xlu0 %943 }
 0x2cf   :  { %v949_v61 = vadd.f32 %v1451_v59, %v944_v60 }
 0x2d1   :  { %951 = vst.msk [vmem:[%s1693_s11] sm:$0xff] %vm950_vm2, %v949_v61 }
 0x2d2   :  { %956 = vsyncpa [#allocation4], 1 }
 0x2d3   :  { %957 = vsyncpa [#allocation6], 1 }

</bundles_post_ra>
